<compile_context>
chip_gen: v7x
topology: tpu7x:2x2x1
jax: 0.10.0
libtpu: 0.0.40
codegen_flags: <defaults>
</compile_context>

<pallas_src>
import math

import jax
import jax.numpy as jnp
from jax.experimental import pallas as pl
from jax.experimental.pallas import tpu as pltpu


def _lcm(a, b):
    return a * b // math.gcd(a, b)


def _round_up(a, u):
    return -(-a // u) * u


def _seq_linear_kernel(x_ref, w_ref, add_ref, o_ref):
    # x_ref: [TM, R*C], w_ref: [R*C, R*H] (block-diagonal), add_ref: [TM, R*H]
    y = jnp.dot(x_ref[...], w_ref[...], preferred_element_type=jnp.float32)
    o_ref[...] = (y + add_ref[...]).astype(o_ref.dtype)


def seq_encoding_forward(seq, w, b, *, add_time=True, tm_target=2048):
    """seq: [B, T, C, 1, 1, ...]; w: [C + add_time, H]; b: [H]."""
    sh = seq.shape
    B, T = sh[0], sh[1]
    for s in sh[3:]:
        assert s == 1
    x = seq.reshape(B, T, -1)            # [B, T, C]
    C = x.shape[-1]
    H = w.shape[1]
    assert w.shape[0] == C + (1 if add_time else 0)

    dtype = x.dtype

    # Split weight into feature part and time part.
    w_x = w[:C].astype(dtype)                                     # [C, H]
    if add_time:
        w_t = w[C].astype(jnp.float32)                            # [H]
    else:
        w_t = jnp.zeros((H,), jnp.float32)
    b32 = b.astype(jnp.float32)                                   # [H]

    # Lane packing factor: pack R consecutive rows into the 128-lane dim.
    if C == H and C <= 128 and (128 % C == 0):
        R = 128 // C
    else:
        R = 1                                                     # unpacked fallback

    M = B * T
    Mp = -(-M // R)                       # packed rows (ceil)
    # Time pattern period measured in packed rows; tile size must be a
    # multiple of it (and of 8 sublanes) so the additive table repeats exactly
    # across grid tiles.
    P = _lcm(T, R) // R
    unit = _lcm(8, P)
    TM = min(_round_up(tm_target, unit), _round_up(Mp, unit))
    Mp_pad = _round_up(Mp, TM)
    n_tiles = Mp_pad // TM
    M_pad = Mp_pad * R

    # Row-major reinterpretation into the packed, padded slab.
    x2 = x.reshape(M, C)
    if M_pad != M:
        x2 = jnp.pad(x2, ((0, M_pad - M), (0, 0)))
    xp = x2.reshape(Mp_pad, R * C)                                # [Mp_pad, R*C]

    # Block-diagonal weight: y_packed = x_packed @ W_blk is R independent
    # row-wise applications of W.
    if R > 1:
        w_blk = jnp.kron(jnp.eye(R, dtype=dtype), w_x)            # [R*C, R*H]
    else:
        w_blk = w_x

    # Additive table (time * w_t + b) for one tile, period-aligned.
    r_idx = jnp.arange(TM, dtype=jnp.int32)
    k_idx = jnp.arange(R, dtype=jnp.int32)
    t = ((r_idx[:, None] * R + k_idx[None, :]) % T).astype(jnp.float32)  # [TM, R]
    add_blk = (t[:, :, None] * w_t[None, None, :]
               + b32[None, None, :]).reshape(TM, R * H)           # [TM, R*H]

    out = pl.pallas_call(
        _seq_linear_kernel,
        out_shape=jax.ShapeDtypeStruct((Mp_pad, R * H), dtype),
        grid=(n_tiles,),
        in_specs=[
            pl.BlockSpec((TM, R * C), lambda i: (i, 0)),          # streamed rows
            pl.BlockSpec((R * C, R * H), lambda i: (0, 0)),       # resident weight
            pl.BlockSpec((TM, R * H), lambda i: (0, 0)),          # resident add table
        ],
        out_specs=pl.BlockSpec((TM, R * H), lambda i: (i, 0)),
        compiler_params=pltpu.CompilerParams(
            dimension_semantics=("parallel",),
            vmem_limit_bytes=32 * 1024 * 1024,
        ),
    )(xp, w_blk, add_blk)

    # Un-pack (bitwise row-major equivalence), drop padding, restore shape.
    out = out.reshape(M_pad, H)[:M]
    return out.reshape(sh[:2] + (H,) + sh[3:])


if __name__ == "__main__":
    B, T, nz_enc = 2, 8, 32
    add_time = True

    key = jax.random.PRNGKey(0)
    k_seq, k_w, k_b = jax.random.split(key, 3)
    seq = jax.random.normal(k_seq, (B, T, nz_enc, 1, 1), dtype=jnp.float32)
    # deterministic parameter init for net = Linear(nz_enc + 1, nz_enc)
    w = jax.random.normal(k_w, (nz_enc + add_time, nz_enc), jnp.float32) * 0.05
    b = jax.random.normal(k_b, (nz_enc,), jnp.float32) * 0.05

    out = seq_encoding_forward(seq, w, b, add_time=True)
    out = jax.block_until_ready(out)

    # pure-JAX reference of the PyTorch forward
    x = seq.reshape(B, T, -1)
    time = jnp.broadcast_to(
        jnp.arange(T, dtype=x.dtype)[None, :, None], (B, T, 1))
    ref = (jnp.concatenate([x, time], axis=2) @ w + b).reshape(B, T, -1, 1, 1)

    assert out.shape == (B, T, nz_enc, 1, 1), out.shape
    assert jnp.allclose(out, ref, atol=1e-4, rtol=1e-4), "mismatch vs reference"
    print("KERNEL_OK")
</pallas_src>

<mosaic_0001>
module attributes {stable_mosaic.version = 11 : i64} {
  func.func @_seq_linear_kernel(%arg0: i32, %arg1: memref<8x128xf32, #tpu.memory_space<vmem>>, %arg2: memref<128x128xf32, #tpu.memory_space<vmem>>, %arg3: memref<8x128xf32, #tpu.memory_space<vmem>>, %arg4: memref<8x128xf32, #tpu.memory_space<vmem>>) attributes {dimension_semantics = [#tpu.dimension_semantics<parallel>], iteration_bounds = array<i64: 1>, scalar_prefetch = 0 : i64, scratch_operands = 0 : i64, tpu.core_type = #tpu.core_type<tc>, window_params = [{transform_indices = @transform_0, window_bounds = array<i64: 8, 128>}, {pipeline_mode = #tpu.pipeline_mode<synchronous>, transform_indices = @transform_1, window_bounds = array<i64: 128, 128>}, {pipeline_mode = #tpu.pipeline_mode<synchronous>, transform_indices = @transform_2, window_bounds = array<i64: 8, 128>}, {transform_indices = @transform_3, window_bounds = array<i64: 8, 128>}]} {
    %c0 = arith.constant 0 : index
    %c0_0 = arith.constant 0 : index
    %0 = vector.load %arg1[%c0, %c0_0] : memref<8x128xf32, #tpu.memory_space<vmem>>, vector<8x128xf32>
    %c0_1 = arith.constant 0 : index
    %c0_2 = arith.constant 0 : index
    %1 = vector.load %arg2[%c0_1, %c0_2] : memref<128x128xf32, #tpu.memory_space<vmem>>, vector<128x128xf32>
    %cst = arith.constant dense<0.000000e+00> : vector<8x128xf32>
    %2 = tpu.matmul %0, %1, %cst {dimension_numbers = #tpu.dot_dimension_numbers<[1], [0], [0], [1], [0, 0, 1, 1], [], []>} : vector<8x128xf32>, vector<128x128xf32>, vector<8x128xf32> -> vector<8x128xf32>
    %c0_3 = arith.constant 0 : index
    %c0_4 = arith.constant 0 : index
    %3 = vector.load %arg3[%c0_3, %c0_4] : memref<8x128xf32, #tpu.memory_space<vmem>>, vector<8x128xf32>
    %4 = arith.addf %2, %3 : vector<8x128xf32>
    %c0_5 = arith.constant 0 : index
    %c0_6 = arith.constant 0 : index
    %5 = vector.load %arg4[%c0_5, %c0_6] : memref<8x128xf32, #tpu.memory_space<vmem>>, vector<8x128xf32>
    tpu.vector_store %arg4[%c0_5, %c0_6], %4 {strides = array<i32>} : memref<8x128xf32, #tpu.memory_space<vmem>>, vector<8x128xf32>,
    return
  }
  func.func @transform_0(%arg0: i32) -> (i32, i32) {
    %c0_i32 = arith.constant 0 : i32
    %c0_i32_0 = arith.constant 0 : i32
    return %arg0, %c0_i32 : i32, i32
  }
  func.func @transform_1(%arg0: i32) -> (i32, i32) {
    %c0_i32 = arith.constant 0 : i32
    %c0_i32_0 = arith.constant 0 : i32
    %c0_i32_1 = arith.constant 0 : i32
    return %c0_i32, %c0_i32_0 : i32, i32
  }
  func.func @transform_2(%arg0: i32) -> (i32, i32) {
    %c0_i32 = arith.constant 0 : i32
    %c0_i32_0 = arith.constant 0 : i32
    %c0_i32_1 = arith.constant 0 : i32
    return %c0_i32, %c0_i32_0 : i32, i32
  }
  func.func @transform_3(%arg0: i32) -> (i32, i32) {
    %c0_i32 = arith.constant 0 : i32
    %c0_i32_0 = arith.constant 0 : i32
    return %arg0, %c0_i32 : i32, i32
  }
}

</mosaic_0001>

<bundles_post_ra>
// kernel: tpu_custom_call.1
= control target key start
LH: loop header
LB: loop body
LE: loop exit
PB: predicated region body
PF: predicated region fallthrough
CT: control target
= control target key end

     0   :  { %8 = vsyncpa [#allocation3], 0  ;;  %s413_s0 = inlined_call_operand.hbm [shape: f32[8,128], index: 0, kind: input, shape index: {}]   ;;  %s414_s1 = inlined_call_operand.hbm [shape: f32[128,128], index: 1, kind: input, shape index: {}]   ;;  %s415_s2 = inlined_call_operand.hbm [shape: f32[8,128], index: 2, kind: input, shape index: {}]   ;;  %s416_s3 = inlined_call_operand.hbm [shape: f32[8,128], index: 3, kind: output, shape index: {}]  }
   0x1   :  { %9 = vsyncpa [#allocation6], 0 }
   0x2   :  { %10 = vsyncpa [#allocation4], 0  ;;  %s336_s12 = smov [#allocation5]   ;;  %s242_s16 = scalar_lea.hbm %s414_s1, 2048 }
   0x3   :  { %s26_s13 = sshll.u32 %s336_s12, 4  ;;  %p243_p0 = scmp.ne.s32.totalorder %s414_s1, %s242_s16  ;;  %s27_s13 = int_to_ptr.vmem [resolvable:$true] %s26_s13 }
   0x4   :  { %p246_p1 = scmp.lt.u32.totalorder %s242_s16, %s414_s1 }
   0x6   :  { %p248_p2 = pnand %p246_p1, %p243_p0 }
   0x8   :  { %251 = shalt.err (!%p248_p2)
}
   0x9   :  { %s252_s21 = scalar_lea.vmem %s27_s13, 2048  ;;  %p257_p4 = scmp.lt.s32.totalorder %s27_s13, %s27_s13 }
   0xa   :  { %p253_p3 = scmp.ne.s32.totalorder %s27_s13, %s252_s21  ;;  %p258_p5 = scmp.lt.s32.totalorder %s252_s21, %s252_s21 }
   0xc   :  { %p259_p6 = por %p258_p5, %p257_p4 }
   0xe   :  { %p260_p7 = pnand %p259_p6, %p253_p3 }
  0x10   :  { %263 = shalt.err (!%p260_p7)
}
  0x11   :  { %s337_s22 = smov 128   ;;  %s338_s23 = smov 8  }
  0x12   :  { %32 = dma.hbm_to_vmem [thread:$0]  %s414_s1, 2048, %s27_s13, [#allocation6], %s337_s22, %s337_s22, %s338_s23  }
  0x13   :  { %s339_s26 = smov [#allocation2]   ;;  %s340_s28 = smov [#allocation7]  }
  0x14   :  { %s17_s27 = sshll.u32 %s339_s26, 4  ;;  %s39_s29 = sshll.u32 %s340_s28, 4  ;;  %s18_s27 = int_to_ptr.vmem [resolvable:$true] %s17_s27  ;;  %s40_s29 = int_to_ptr.vmem [resolvable:$true] %s39_s29 }
  0x15   :  { %s264_s5 = scalar_lea.hbm %s413_s0, 128 }
  0x16   :  { %p265_p8 = scmp.ne.s32.totalorder %s413_s0, %s264_s5  ;;  %p268_p9 = scmp.lt.u32.totalorder %s264_s5, %s413_s0 }
  0x18   :  { %p270_p10 = pnand %p268_p9, %p265_p8 }
  0x1a   :  { %273 = shalt.err (!%p270_p10)
}
  0x1b   :  { %s274_s1 = scalar_lea.vmem %s18_s27, 128  ;;  %p279_p12 = scmp.lt.s32.totalorder %s18_s27, %s18_s27 }
  0x1c   :  { %p275_p11 = scmp.ne.s32.totalorder %s18_s27, %s274_s1  ;;  %p280_p13 = scmp.lt.s32.totalorder %s274_s1, %s274_s1 }
  0x1e   :  { %p281_p0 = por %p280_p13, %p279_p12 }
  0x20   :  { %p282_p1 = pnand %p281_p0, %p275_p11 }
  0x22   :  { %285 = shalt.err (!%p282_p1)
}
  0x23   :  { %20 = dma.hbm_to_vmem [thread:$0]  %s413_s0, 128, %s18_s27, [#allocation3]  }
  0x24   :  { %s286_s14 = scalar_lea.hbm %s415_s2, 128 }
  0x25   :  { %p287_p2 = scmp.ne.s32.totalorder %s415_s2, %s286_s14  ;;  %p290_p3 = scmp.lt.u32.totalorder %s286_s14, %s415_s2 }
  0x27   :  { %p292_p4 = pnand %p290_p3, %p287_p2 }
  0x29   :  { %295 = shalt.err (!%p292_p4)
}
  0x2a   :  { %s296_s19 = scalar_lea.vmem %s40_s29, 128  ;;  %p301_p6 = scmp.lt.s32.totalorder %s40_s29, %s40_s29 }
  0x2b   :  { %p297_p5 = scmp.ne.s32.totalorder %s40_s29, %s296_s19  ;;  %p302_p7 = scmp.lt.s32.totalorder %s296_s19, %s296_s19 }
  0x2d   :  { %p303_p8 = por %p302_p7, %p301_p6 }
  0x2f   :  { %p304_p9 = pnand %p303_p8, %p297_p5 }
  0x31   :  { %307 = shalt.err (!%p304_p9)
}
  0x32   :  { %42 = dma.hbm_to_vmem [thread:$0]  %s415_s2, 128, %s40_s29, [#allocation6]  }
  0x33   :  { %330 = dma.done.wait [#allocation3], 128  }
  0x34   :  { %331 = vsyncadd [#allocation3], 4294967168 }
  0x35   :  { %332 = dma.done.wait [#allocation6], 2176  }
  0x36   :  { %333 = vsyncadd [#allocation6], 4294965120  ;;  %v341_v0 = vmov 0.0|0.0   ;;  %vm342_vm0 = vmmov 0   ;;  %v343_v1 = vmov 0.0   ;;  %v53_v2 = vld [vmem:[#allocation5] sm:$0xff] }
  0x37   :  { %209 = vmatprep.subr.bf16.mxu0 %v341_v0  ;;  %206 = vmatprep.mubr.msk.f32.mxu0 %vm342_vm0, %v343_v1  ;;  %v54_v3 = vld [vmem:[#allocation5 + $0x8] sm:$0xff]  ;;  %v55_v4 = vld [vmem:[#allocation5 + $0x10] sm:$0xff]  ;;  %v56_v6 = vld [vmem:[#allocation5 + $0x18] sm:$0xff]  ;;  %s344_s2 = smov [#allocation8]  }
  0x38   :  { %v210_v5 = vpack.c.bf16 %v54_v3, %v53_v2  ;;  %v213_v7 = vpack.c.bf16 %v56_v6, %v55_v4  ;;  %v57_v8 = vld [vmem:[#allocation5 + $0x20] sm:$0xff]  ;;  %v58_v9 = vld [vmem:[#allocation5 + $0x28] sm:$0xff]  ;;  %v59_v11 = vld [vmem:[#allocation5 + $0x30] sm:$0xff]  ;;  %s147_s21 = sshll.u32 %s344_s2, 4  ;;  %s148_s21 = int_to_ptr.vmem [resolvable:$true] %s147_s21 }
  0x39   :  { %v216_v10 = vpack.c.bf16 %v58_v9, %v57_v8  ;;  %v60_v12 = vld [vmem:[#allocation5 + $0x38] sm:$0xff]  ;;  %v61_v14 = vld [vmem:[#allocation5 + $0x40] sm:$0xff]  ;;  %v62_v15 = vld [vmem:[#allocation5 + $0x48] sm:$0xff]  ;;  %s308_s22 = scalar_lea.vmem %s148_s21, 128  ;;  %p313_p11 = scmp.lt.s32.totalorder %s148_s21, %s148_s21 }
  0x3a   :  { %211 = vmatpush3.bf16.msra.mxu0 %v210_v5  ;;  %v219_v13 = vpack.c.bf16 %v60_v12, %v59_v11  ;;  %v222_v16 = vpack.c.bf16 %v62_v15, %v61_v14  ;;  %v63_v17 = vld [vmem:[#allocation5 + $0x50] sm:$0xff]  ;;  %v64_v18 = vld [vmem:[#allocation5 + $0x58] sm:$0xff]  ;;  %v65_v20 = vld [vmem:[#allocation5 + $0x60] sm:$0xff]  ;;  %p309_p10 = scmp.ne.s32.totalorder %s148_s21, %s308_s22  ;;  %p314_p12 = scmp.lt.s32.totalorder %s308_s22, %s308_s22 }
  0x3b   :  { %212 = vmatprep.subr.bf16.mxu0 %v341_v0  ;;  %v225_v19 = vpack.c.bf16 %v64_v18, %v63_v17  ;;  %v66_v21 = vld [vmem:[#allocation5 + $0x68] sm:$0xff]  ;;  %v67_v23 = vld [vmem:[#allocation5 + $0x70] sm:$0xff]  ;;  %v68_v24 = vld [vmem:[#allocation5 + $0x78] sm:$0xff] }
  0x3c   :  { %v228_v22 = vpack.c.bf16 %v66_v21, %v65_v20  ;;  %v231_v25 = vpack.c.bf16 %v68_v24, %v67_v23  ;;  %v52_v26 = vld [vmem:[#allocation2] sm:$0xff]  ;;  %v69_v27 = vld [vmem:[#allocation7] sm:$0xff]  ;;  %p315_p13 = por %p314_p12, %p313_p11 }
  0x3e   :  { %214 = vmatpush3.bf16.msra.mxu0 %v213_v7  ;;  %p316_p0 = pnand %p315_p13, %p309_p10 }
  0x3f   :  { %215 = vmatprep.subr.bf16.mxu0 %v341_v0 }
  0x42   :  { %217 = vmatpush3.bf16.msra.mxu0 %v216_v10 }
  0x43   :  { %218 = vmatprep.subr.bf16.mxu0 %v341_v0 }
  0x46   :  { %220 = vmatpush3.bf16.msra.mxu0 %v219_v13 }
  0x47   :  { %221 = vmatprep.subr.bf16.mxu0 %v341_v0 }
  0x4a   :  { %223 = vmatpush3.bf16.msra.mxu0 %v222_v16 }
  0x4b   :  { %224 = vmatprep.subr.bf16.mxu0 %v341_v0 }
  0x4e   :  { %226 = vmatpush3.bf16.msra.mxu0 %v225_v19 }
  0x4f   :  { %227 = vmatprep.subr.bf16.mxu0 %v341_v0 }
  0x52   :  { %229 = vmatpush3.bf16.msra.mxu0 %v228_v22 }
  0x53   :  { %230 = vmatprep.subr.bf16.mxu0 %v341_v0 }
  0x56   :  { %232 = vmatpush3.bf16.msra.mxu0 %v231_v25 }
  0x59   :  { %207 = vmatmul.mubr.f32.vlgmr.msra.gmra.mrb[0].mxu0 %v52_v26 }
 0x12c   :  { %v136_v28 = vpop.f32.mrb[0].mxu0 }
 0x12d   :  { %v137_v29 = vadd.f32 %v136_v28, %v69_v27  ;;  %v208_v30 = vpop.f32.mrb[1].mxu0 }
 0x12f   :  { %140 = vst [vmem:[#allocation8] sm:$0xff] %v137_v29 }
 0x130   :  { %319 = shalt.err (!%p316_p0)
}
 0x131   :  { %s320_s25 = scalar_lea.hbm %s416_s3, 128 }
 0x132   :  { %p321_p1 = scmp.ne.s32.totalorder %s416_s3, %s320_s25  ;;  %p324_p2 = scmp.lt.u32.totalorder %s320_s25, %s416_s3 }
 0x134   :  { %p326_p3 = pnand %p324_p2, %p321_p1 }
 0x136   :  { %329 = shalt.err (!%p326_p3)
}
 0x137   :  { %150 = dma.vmem_to_hbm [thread:$0]  %s148_s21, 128, %s416_s3, [#allocation4]  }
 0x138   :  { %334 = dma.done.wait [#allocation4], 128  }
 0x139   :  { %335 = vsyncadd [#allocation4], 4294967168 }
 0x13a   :  { %154 = vsyncpa [#allocation3], 1 }
 0x13b   :  { %155 = vsyncpa [#allocation6], 1 }
 0x13c   :  { %156 = vsyncpa [#allocation4], 1 }

</bundles_post_ra>
